<compile_context>
chip_gen: v7x
topology: tpu7x:2x2x1
jax: 0.10.0
libtpu: 0.0.40
codegen_flags: <defaults>
</compile_context>

<pallas_src>
import numpy as np
import jax
import jax.numpy as jnp
from jax import lax
from jax.experimental import pallas as pl
from jax.experimental.pallas import tpu as pltpu

# ----------------------------- model hyper-params -----------------------------
B = 2                     # batch
L = 8                     # sequence length
N_ENSEMBLE = 2
MAX_NUM_NODE = 15
D_WORD_VEC = 16
D_MODEL = D_WORD_VEC      # LayerNorm(d_model) applied over the d_word_vec axis
SZ_INPUT_VEC = N_ENSEMBLE * (MAX_NUM_NODE + 1)   # 32
SZ_EMB = N_ENSEMBLE * D_WORD_VEC                 # 32
SZ_INTERMED = max(SZ_INPUT_VEC, SZ_EMB)          # 32  (== SZ_EMB in this config)
N_POSITION = 1000
LN_EPS = 1e-6

# The slab packing below hardcodes equal widths for biases / LN params / weights.
assert SZ_INTERMED == SZ_EMB, "packing assumes sz_intermed == sz_emb (n_ensemble*d_word_vec)"

W_ROWS = SZ_INPUT_VEC + 2 * SZ_INTERMED + SZ_EMB   # w1 | w2 | w3 | block-diag averaging


# ----------------------------- fused Pallas kernel -----------------------------
def encoder_fused_kernel(x_ref, w_ref, c_ref, pos_ref, o_ref):
    """Fused: Linear+ReLU -> Linear+ReLU -> Linear -> +(pos+b3) -> grouped LayerNorm.

    x_ref  : (bm, SZ_INPUT_VEC)                 flattened (b, l) rows
    w_ref  : (W_ROWS, SZ_EMB)                   [w1; w2; w3; A] row-packed, A = block-diag 1/D
    c_ref  : (4, SZ_EMB)                        [b1; b2; gamma_tiled; beta_tiled]
    pos_ref: (bm, SZ_EMB)                       sinusoid rows pre-tiled over (batch, ensemble) + b3
    o_ref  : (bm, SZ_EMB)                       lane-dense output (E*D per row)
    Dropout(p=0.1) is identity (eval mode).
    """
    x = x_ref[...]
    w = w_ref[...]
    c = c_ref[...]

    r0 = SZ_INPUT_VEC
    r1 = r0 + SZ_INTERMED
    r2 = r1 + SZ_INTERMED
    w1 = w[0:r0, :]          # (SZ_INPUT_VEC, SZ_INTERMED)
    w2 = w[r0:r1, :]         # (SZ_INTERMED, SZ_INTERMED)
    w3 = w[r1:r2, :]         # (SZ_INTERMED, SZ_EMB)
    avg = w[r2:, :]          # (SZ_EMB, SZ_EMB)   block-diagonal averaging matrix

    h = jnp.maximum(jnp.dot(x, w1, preferred_element_type=jnp.float32) + c[0:1, :], 0.0)
    h = jnp.maximum(jnp.dot(h, w2, preferred_element_type=jnp.float32) + c[1:2, :], 0.0)
    # b3 is folded into pos_ref on the host, so only one add here
    z = jnp.dot(h, w3, preferred_element_type=jnp.float32) + pos_ref[...]   # (bm, E*D)

    # Grouped LayerNorm over each D_MODEL-wide ensemble segment, via MXU matmul:
    # mean / E[z^2] come back already broadcast across the lanes of each segment,
    # so no XLU cross-lane reductions, broadcasts, or lane-domain concat are needed.
    mean = jnp.dot(z, avg, preferred_element_type=jnp.float32)
    ex2 = jnp.dot(z * z, avg, preferred_element_type=jnp.float32)
    var = ex2 - mean * mean
    y = (z - mean) * lax.rsqrt(var + LN_EPS)

    o_ref[...] = y * c[2:3, :] + c[3:4, :]


# ----------------------------- parameter setup ---------------------------------
def sinusoid_table(n_position, d_hid):
    pos = np.arange(n_position, dtype=np.float64)[:, None]
    hid = np.arange(d_hid)[None, :]
    table = pos / np.power(10000.0, 2.0 * (hid // 2) / d_hid)
    table[:, 0::2] = np.sin(table[:, 0::2])
    table[:, 1::2] = np.cos(table[:, 1::2])
    return jnp.asarray(table, dtype=jnp.float32)          # (n_position, d_hid)


def init_params(key):
    ks = jax.random.split(key, 8)
    scale = 0.05
    w1 = scale * jax.random.normal(ks[0], (SZ_INPUT_VEC, SZ_INTERMED), jnp.float32)
    b1 = scale * jax.random.normal(ks[1], (1, SZ_INTERMED), jnp.float32)
    w2 = scale * jax.random.normal(ks[2], (SZ_INTERMED, SZ_INTERMED), jnp.float32)
    b2 = scale * jax.random.normal(ks[3], (1, SZ_INTERMED), jnp.float32)
    w3 = scale * jax.random.normal(ks[4], (SZ_INTERMED, SZ_EMB), jnp.float32)
    b3 = scale * jax.random.normal(ks[5], (1, SZ_EMB), jnp.float32)
    # learnable LayerNorm affine params (randomized to exercise the packing)
    ln_gamma = 1.0 + 0.1 * jax.random.normal(ks[6], (D_MODEL,), jnp.float32)
    ln_beta = 0.1 * jax.random.normal(ks[7], (D_MODEL,), jnp.float32)
    pos_table = sinusoid_table(N_POSITION, D_WORD_VEC)    # (n_position, D)

    unpacked = {"w1": w1, "b1": b1, "w2": w2, "b2": b2, "w3": w3, "b3": b3,
                "ln_gamma": ln_gamma, "ln_beta": ln_beta, "pos_table": pos_table}

    # block-diagonal averaging matrix: A[i, j] = 1/D if i, j in the same ensemble segment
    seg = np.repeat(np.arange(N_ENSEMBLE), D_MODEL)
    avg_mat = jnp.asarray((seg[:, None] == seg[None, :]).astype(np.float32) / D_MODEL)

    # host-precomputed constant: positional rows tiled over (ensemble lanes, batch) + b3 folded in
    pos_ed = jnp.tile(pos_table[:L], (1, N_ENSEMBLE))          # (L, E*D)
    pos_b3 = jnp.tile(pos_ed, (B, 1)) + b3                     # (B*L, E*D)

    packed = {
        # row-packed weights + averaging matrix: sublane slices at multiples of 8 in-kernel
        "w_packed": jnp.concatenate([w1, w2, w3, avg_mat], axis=0),        # (W_ROWS, 32)
        # biases + LN affine params (tiled over ensemble lanes) in one slab
        "consts": jnp.concatenate(
            [b1, b2,
             jnp.tile(ln_gamma[None, :], (1, N_ENSEMBLE)),
             jnp.tile(ln_beta[None, :], (1, N_ENSEMBLE))], axis=0),        # (4, 32)
        "pos_b3": pos_b3,                                                  # (B*L, 32)
    }
    assert packed["w_packed"].shape == (W_ROWS, SZ_EMB)
    return packed, unpacked


# ----------------------------- encoder forward ----------------------------------
def encoder_forward(src_seq, packed, src_mask=None, gr_mask=None, adj=None,
                    gr_pos_enc_kernel=None, block_m=512):
    """Returns (enc_output,) with enc_output of shape (B, L, E, d_word_vec)."""
    del src_mask, gr_mask, adj, gr_pos_enc_kernel  # only used by EncoderLayer / graph PE
    Bx, Lx, Ex, Fx = src_seq.shape
    M = Bx * Lx
    # src_seq.view(B, L, -1)
    x2 = src_seq.reshape(M, Ex * Fx).astype(jnp.float32)
    w_packed = packed["w_packed"]
    consts = packed["consts"]
    pos_b3 = packed["pos_b3"]
    assert pos_b3.shape == (M, SZ_EMB)

    # Tile rows only when there is enough work (M a multiple of block_m); at the demo
    # size this collapses to one grid step (splitting latency-bound work is overhead).
    if M % block_m != 0 or M < block_m:
        block_m = M
    nm = M // block_m

    cost = pl.CostEstimate(
        flops=2 * M * (SZ_INPUT_VEC * SZ_INTERMED + SZ_INTERMED * SZ_INTERMED
                       + SZ_INTERMED * SZ_EMB + 2 * SZ_EMB * SZ_EMB),
        transcendentals=0,
        bytes_accessed=4 * (x2.size + w_packed.size + consts.size
                            + pos_b3.size + M * SZ_EMB),
    )

    out = pl.pallas_call(
        encoder_fused_kernel,
        grid=(nm,),
        in_specs=[
            pl.BlockSpec((block_m, SZ_INPUT_VEC), lambda i: (i, 0)),   # activations, tiled
            pl.BlockSpec(w_packed.shape, lambda i: (0, 0)),            # weight slab, resident
            pl.BlockSpec(consts.shape, lambda i: (0, 0)),              # consts slab, resident
            pl.BlockSpec((block_m, SZ_EMB), lambda i: (i, 0)),         # pos + b3, tiled
        ],
        out_specs=pl.BlockSpec((block_m, SZ_EMB), lambda i: (i, 0)),
        out_shape=jax.ShapeDtypeStruct((M, SZ_EMB), jnp.float32),
        compiler_params=pltpu.CompilerParams(dimension_semantics=("parallel",)),
        cost_estimate=cost,
    )(x2, w_packed, consts, pos_b3)

    # (B*L, E*D) -> (B, L, E, D); scale_emb == False -> no scaling
    enc_output = out.reshape(Bx, Lx, Ex, D_WORD_VEC)
    # n_layers == 0: empty layer_stack, no termination-bit stack, no attn list
    return (enc_output,)


# ----------------------------- pure-JAX reference --------------------------------
def encoder_reference(src_seq, p):
    Bx, Lx, Ex, Fx = src_seq.shape
    x = src_seq.reshape(Bx * Lx, Ex * Fx).astype(jnp.float32)
    h = jnp.maximum(x @ p["w1"] + p["b1"], 0.0)
    h = jnp.maximum(h @ p["w2"] + p["b2"], 0.0)
    e = (h @ p["w3"] + p["b3"]).reshape(Bx, Lx, Ex, D_WORD_VEC)
    e = e + p["pos_table"][:Lx][None, :, None, :]
    mean = jnp.mean(e, axis=-1, keepdims=True)
    var = jnp.mean((e - mean) ** 2, axis=-1, keepdims=True)
    y = (e - mean) / jnp.sqrt(var + LN_EPS)
    return y * p["ln_gamma"].reshape(1, 1, 1, -1) + p["ln_beta"].reshape(1, 1, 1, -1)


# ----------------------------------- main ----------------------------------------
if __name__ == "__main__":
    key = jax.random.PRNGKey(0)
    k_in, k_par = jax.random.split(key)

    # src_seq: (B, L, n_ensemble, max_num_node + 1) binary-ish adjacency features
    src_seq = (jax.random.uniform(k_in, (B, L, N_ENSEMBLE, MAX_NUM_NODE + 1),
                                  jnp.float32) < 0.3).astype(jnp.float32)
    packed, unpacked = init_params(k_par)

    (enc_output,) = encoder_forward(src_seq, packed)
    enc_output = jax.block_until_ready(enc_output)

    ref = encoder_reference(src_seq, unpacked)
    np.testing.assert_allclose(np.asarray(enc_output), np.asarray(ref),
                               rtol=1e-4, atol=1e-4)
    assert enc_output.shape == (B, L, N_ENSEMBLE, D_WORD_VEC)
    print("KERNEL_OK")
</pallas_src>

<mosaic_0001>
module attributes {stable_mosaic.version = 11 : i64} {
  func.func @encoder_fused_kernel(%arg0: i32, %arg1: memref<16x32xf32, #tpu.memory_space<vmem>>, %arg2: memref<128x32xf32, #tpu.memory_space<vmem>>, %arg3: memref<4x32xf32, #tpu.memory_space<vmem>>, %arg4: memref<16x32xf32, #tpu.memory_space<vmem>>, %arg5: memref<16x32xf32, #tpu.memory_space<vmem>>) attributes {dimension_semantics = [#tpu.dimension_semantics<parallel>], iteration_bounds = array<i64: 1>, scalar_prefetch = 0 : i64, scratch_operands = 0 : i64, tpu.core_type = #tpu.core_type<tc>, window_params = [{transform_indices = @transform_0, window_bounds = array<i64: 16, 32>}, {pipeline_mode = #tpu.pipeline_mode<synchronous>, transform_indices = @transform_1, window_bounds = array<i64: 128, 32>}, {pipeline_mode = #tpu.pipeline_mode<synchronous>, transform_indices = @transform_2, window_bounds = array<i64: 4, 32>}, {transform_indices = @transform_3, window_bounds = array<i64: 16, 32>}, {transform_indices = @transform_4, window_bounds = array<i64: 16, 32>}]} {
    %c0 = arith.constant 0 : index
    %c0_0 = arith.constant 0 : index
    %0 = vector.load %arg1[%c0, %c0_0] : memref<16x32xf32, #tpu.memory_space<vmem>>, vector<16x32xf32>
    %c0_1 = arith.constant 0 : index
    %c0_2 = arith.constant 0 : index
    %1 = vector.load %arg2[%c0_1, %c0_2] : memref<128x32xf32, #tpu.memory_space<vmem>>, vector<128x32xf32>
    %c0_3 = arith.constant 0 : index
    %c0_4 = arith.constant 0 : index
    %2 = vector.load %arg3[%c0_3, %c0_4] : memref<4x32xf32, #tpu.memory_space<vmem>>, vector<4x32xf32>
    %3 = vector.extract_strided_slice %1 {offsets = [0, 0], sizes = [32, 32], strides = [1, 1]} : vector<128x32xf32> to vector<32x32xf32>
    %4 = vector.extract_strided_slice %1 {offsets = [32, 0], sizes = [32, 32], strides = [1, 1]} : vector<128x32xf32> to vector<32x32xf32>
    %5 = vector.extract_strided_slice %1 {offsets = [64, 0], sizes = [32, 32], strides = [1, 1]} : vector<128x32xf32> to vector<32x32xf32>
    %6 = vector.extract_strided_slice %1 {offsets = [96, 0], sizes = [32, 32], strides = [1, 1]} : vector<128x32xf32> to vector<32x32xf32>
    %cst = arith.constant dense<0.000000e+00> : vector<16x32xf32>
    %7 = tpu.matmul %0, %3, %cst {dimension_numbers = #tpu.dot_dimension_numbers<[1], [0], [0], [1], [0, 0, 1, 1], [], []>} : vector<16x32xf32>, vector<32x32xf32>, vector<16x32xf32> -> vector<16x32xf32>
    %8 = vector.extract_strided_slice %2 {offsets = [0, 0], sizes = [1, 32], strides = [1, 1]} : vector<4x32xf32> to vector<1x32xf32>
    %9 = vector.broadcast %8 : vector<1x32xf32> to vector<16x32xf32>
    %10 = arith.addf %7, %9 : vector<16x32xf32>
    %cst_5 = arith.constant 0.000000e+00 : f32
    %11 = vector.broadcast %cst_5 : f32 to vector<16x32xf32>
    %12 = arith.maximumf %10, %11 : vector<16x32xf32>
    %cst_6 = arith.constant dense<0.000000e+00> : vector<16x32xf32>
    %13 = tpu.matmul %12, %4, %cst_6 {dimension_numbers = #tpu.dot_dimension_numbers<[1], [0], [0], [1], [0, 0, 1, 1], [], []>} : vector<16x32xf32>, vector<32x32xf32>, vector<16x32xf32> -> vector<16x32xf32>
    %14 = vector.extract_strided_slice %2 {offsets = [1, 0], sizes = [1, 32], strides = [1, 1]} : vector<4x32xf32> to vector<1x32xf32>
    %15 = vector.broadcast %14 : vector<1x32xf32> to vector<16x32xf32>
    %16 = arith.addf %13, %15 : vector<16x32xf32>
    %cst_7 = arith.constant 0.000000e+00 : f32
    %17 = vector.broadcast %cst_7 : f32 to vector<16x32xf32>
    %18 = arith.maximumf %16, %17 : vector<16x32xf32>
    %cst_8 = arith.constant dense<0.000000e+00> : vector<16x32xf32>
    %19 = tpu.matmul %18, %5, %cst_8 {dimension_numbers = #tpu.dot_dimension_numbers<[1], [0], [0], [1], [0, 0, 1, 1], [], []>} : vector<16x32xf32>, vector<32x32xf32>, vector<16x32xf32> -> vector<16x32xf32>
    %c0_9 = arith.constant 0 : index
    %c0_10 = arith.constant 0 : index
    %20 = vector.load %arg4[%c0_9, %c0_10] : memref<16x32xf32, #tpu.memory_space<vmem>>, vector<16x32xf32>
    %21 = arith.addf %19, %20 : vector<16x32xf32>
    %cst_11 = arith.constant dense<0.000000e+00> : vector<16x32xf32>
    %22 = tpu.matmul %21, %6, %cst_11 {dimension_numbers = #tpu.dot_dimension_numbers<[1], [0], [0], [1], [0, 0, 1, 1], [], []>} : vector<16x32xf32>, vector<32x32xf32>, vector<16x32xf32> -> vector<16x32xf32>
    %23 = arith.mulf %21, %21 : vector<16x32xf32>
    %cst_12 = arith.constant dense<0.000000e+00> : vector<16x32xf32>
    %24 = tpu.matmul %23, %6, %cst_12 {dimension_numbers = #tpu.dot_dimension_numbers<[1], [0], [0], [1], [0, 0, 1, 1], [], []>} : vector<16x32xf32>, vector<32x32xf32>, vector<16x32xf32> -> vector<16x32xf32>
    %25 = arith.mulf %22, %22 : vector<16x32xf32>
    %26 = arith.subf %24, %25 : vector<16x32xf32>
    %27 = arith.subf %21, %22 : vector<16x32xf32>
    %cst_13 = arith.constant 9.99999997E-7 : f32
    %28 = vector.broadcast %cst_13 : f32 to vector<16x32xf32>
    %29 = arith.addf %26, %28 : vector<16x32xf32>
    %30 = math.rsqrt %29 : vector<16x32xf32>
    %31 = arith.mulf %27, %30 : vector<16x32xf32>
    %32 = vector.extract_strided_slice %2 {offsets = [2, 0], sizes = [1, 32], strides = [1, 1]} : vector<4x32xf32> to vector<1x32xf32>
    %33 = vector.broadcast %32 : vector<1x32xf32> to vector<16x32xf32>
    %34 = arith.mulf %31, %33 : vector<16x32xf32>
    %35 = vector.extract_strided_slice %2 {offsets = [3, 0], sizes = [1, 32], strides = [1, 1]} : vector<4x32xf32> to vector<1x32xf32>
    %36 = vector.broadcast %35 : vector<1x32xf32> to vector<16x32xf32>
    %37 = arith.addf %34, %36 : vector<16x32xf32>
    %c0_14 = arith.constant 0 : index
    %c0_15 = arith.constant 0 : index
    %38 = vector.load %arg5[%c0_14, %c0_15] : memref<16x32xf32, #tpu.memory_space<vmem>>, vector<16x32xf32>
    tpu.vector_store %arg5[%c0_14, %c0_15], %37 {strides = array<i32>} : memref<16x32xf32, #tpu.memory_space<vmem>>, vector<16x32xf32>,
    return
  }
  func.func @transform_0(%arg0: i32) -> (i32, i32) {
    %c0_i32 = arith.constant 0 : i32
    %c0_i32_0 = arith.constant 0 : i32
    return %arg0, %c0_i32 : i32, i32
  }
  func.func @transform_1(%arg0: i32) -> (i32, i32) {
    %c0_i32 = arith.constant 0 : i32
    %c0_i32_0 = arith.constant 0 : i32
    %c0_i32_1 = arith.constant 0 : i32
    return %c0_i32, %c0_i32_0 : i32, i32
  }
  func.func @transform_2(%arg0: i32) -> (i32, i32) {
    %c0_i32 = arith.constant 0 : i32
    %c0_i32_0 = arith.constant 0 : i32
    %c0_i32_1 = arith.constant 0 : i32
    return %c0_i32, %c0_i32_0 : i32, i32
  }
  func.func @transform_3(%arg0: i32) -> (i32, i32) {
    %c0_i32 = arith.constant 0 : i32
    %c0_i32_0 = arith.constant 0 : i32
    return %arg0, %c0_i32 : i32, i32
  }
  func.func @transform_4(%arg0: i32) -> (i32, i32) {
    %c0_i32 = arith.constant 0 : i32
    %c0_i32_0 = arith.constant 0 : i32
    return %arg0, %c0_i32 : i32, i32
  }
}

</mosaic_0001>

<bundles_post_ra>
// kernel: tpu_custom_call.1
= control target key start
LH: loop header
LB: loop body
LE: loop exit
PB: predicated region body
PF: predicated region fallthrough
CT: control target
= control target key end

     0   :  { %vm41_vm0 = vcmask 261120   ;;  %s794_s0 = inlined_call_operand.vmem [shape: f32[16,32], index: 0, kind: input, shape index: {}]   ;;  %s795_s1 = inlined_call_operand.vmem [shape: f32[128,32], index: 1, kind: input, shape index: {}]   ;;  %s796_s2 = inlined_call_operand.vmem [shape: f32[4,32], index: 2, kind: input, shape index: {}]   ;;  %s797_s3 = inlined_call_operand.vmem [shape: f32[16,32], index: 3, kind: input, shape index: {}]   ;;  %s798_s4 = inlined_call_operand.hbm [shape: f32[16,32], index: 4, kind: output, shape index: {}]  }
   0x1   :  { %v20_v0 = vld [vmem:[%s795_s1] sm:$0xff]  ;;  %v21_v1 = vld [vmem:[%s795_s1 + $0x8] sm:$0xff]  ;;  %v22_v2 = vld [vmem:[%s795_s1 + $0x10] sm:$0xff] }
   0x2   :  { %v596_v3 = vpack.c.bf16 %v21_v1, %v20_v0  ;;  %v23_v4 = vld [vmem:[%s795_s1 + $0x18] sm:$0xff]  ;;  %v18_v5 = vld [vmem:[%s794_s0] sm:$0xff]  ;;  %v25_v8 = vld [vmem:[%s795_s1 + $0x28] sm:$0xff] }
   0x3   :  { %v600_v6 = vpack.c.bf16 %v23_v4, %v22_v2  ;;  %549 = vmatprep.mubr.msk.f32.mxu0 %vm41_vm0, %v18_v5  ;;  %v24_v7 = vld [vmem:[%s795_s1 + $0x20] sm:$0xff] }
   0x4   :  { %597 = vmatprep.subr.bf16.mxu0 %v596_v3  ;;  %v604_v9 = vpack.c.bf16 %v25_v8, %v24_v7 }
   0x5   :  { %9 = vsyncpa [#allocation3], 0  ;;  %599 = vmatpush3.bf16.msra.mxu0 %v596_v3  ;;  %v19_v10 = vld [vmem:[%s794_s0 + $0x8] sm:$0xff]  ;;  %v26_v11 = vld [vmem:[%s795_s1 + $0x30] sm:$0xff]  ;;  %v37_v17 = vlaneseq }
   0x6   :  { %601 = vmatprep.subr.bf16.mxu0 %v600_v6  ;;  %605 = vmatprep.subr.bf16.mxu1 %v604_v9  ;;  %v27_v12 = vld [vmem:[%s795_s1 + $0x38] sm:$0xff]  ;;  %v28_v14 = vld [vmem:[%s795_s1 + $0x40] sm:$0xff]  ;;  %v29_v15 = vld [vmem:[%s795_s1 + $0x48] sm:$0xff] }
   0x7   :  { %607 = vmatpush3.bf16.msra.mxu1 %v604_v9  ;;  %v608_v13 = vpack.c.bf16 %v27_v12, %v26_v11  ;;  %v612_v16 = vpack.c.bf16 %v29_v15, %v28_v14  ;;  %v733_v18 = vshrl.u32 %v37_v17, 7  ;;  %v739_v20 = vld [vmem:[%s796_s2] sm:$0xf]  ;;  %v30_v28 = vld [vmem:[%s795_s1 + $0x50] sm:$0xff]  ;;  %v31_v29 = vld [vmem:[%s795_s1 + $0x58] sm:$0xff] }
   0x8   :  { %v616_v30 = vpack.c.bf16 %v31_v29, %v30_v28  ;;  %v32_v31 = vld [vmem:[%s795_s1 + $0x60] sm:$0xff]  ;;  %v33_v32 = vld [vmem:[%s795_s1 + $0x68] sm:$0xff]  ;;  %v34_v42 = vld [vmem:[%s795_s1 + $0x70] sm:$0xff] }
   0x9   :  { %603 = vmatpush3.bf16.msra.mxu0 %v600_v6  ;;  %609 = vmatprep.subr.bf16.mxu1 %v608_v13  ;;  %v39_v19 = vsub.s32 0, %v733_v18  ;;  %v620_v33 = vpack.c.bf16 %v33_v32, %v32_v31  ;;  %v127_v34 = vsub.s32 1, %v733_v18  ;;  %v35_v43 = vld [vmem:[%s795_s1 + $0x78] sm:$0xff]  ;;  %v213_v45 = vld [vmem:[%s797_s3 + $0x8] sm:$0xff]  ;;  %v212_v46 = vld [vmem:[%s797_s3] sm:$0xff]  ;;  %v473_v63 = vsub.s32 2, %v733_v18 }
   0xa   :  { %613 = vmatprep.subr.bf16.mxu0 %v612_v16  ;;  %v624_v44 = vpack.c.bf16 %v35_v43, %v34_v42  ;;  %v479_v0 = vsub.s32 3, %v733_v18  ;;  %s667_s1 = smov [#allocation2]  }
   0xb   :  { %611 = vmatpush3.bf16.msra.mxu1 %v608_v13  ;;  %v40_v21 = vrot.slane %v739_v20, %v39_v19  ;;  %v128_v35 = vrot.slane %v739_v20, %v127_v34  ;;  %v474_v1 = vrot.slane %v739_v20, %v473_v63  ;;  %s490_s3 = sshll.u32 %s667_s1, 4  ;;  %s491_s3 = int_to_ptr.vmem [resolvable:$true] %s490_s3 }
   0xc   :  { %550 = vmatmul.mubr.msk.f32.vlgmr.msra.gmra.mrb[0].mxu0 %vm41_vm0, %v19_v10  ;;  %621 = vmatprep.subr.bf16.mxu1 %v620_v33  ;;  %v480_v6 = vrot.slane %v739_v20, %v479_v0  ;;  %s643_s29 = scalar_lea.vmem %s491_s3, 256  ;;  %p648_p1 = scmp.lt.s32.totalorder %s491_s3, %s491_s3 }
   0xd   :  { %615 = vmatpush3.bf16.msra.mxu0 %v612_v16  ;;  %p644_p0 = scmp.ne.s32.totalorder %s491_s3, %s643_s29  ;;  %p649_p2 = scmp.lt.s32.totalorder %s643_s29, %s643_s29 }
   0xe   :  { %617 = vmatprep.subr.bf16.mxu0 %v616_v30 }
   0xf   :  { %p650_p3 = por %p649_p2, %p648_p1 }
  0x11   :  { %619 = vmatpush3.bf16.msra.mxu0 %v616_v30  ;;  %p651_p4 = pnand %p650_p3, %p644_p0 }
  0x12   :  { %629 = vmatprep.subr.bf16.mxu0 %v620_v33 }
  0xdf   :  { %v551_v22 = vpop.f32.mrb[0].mxu0 }
  0xe0   :  { %v120_v23 = vadd.f32 %v551_v22, %v40_v21  ;;  %v114_v24 = vpop.f32.mrb[1].mxu0 }
  0xe1   :  { %v115_v25 = vadd.f32 %v114_v24, %v40_v21 }
  0xe2   :  { %v124_v27 = vmax.f32 %v120_v23, 0.0 }
  0xe3   :  { %v123_v26 = vmax.f32 %v115_v25, 0.0 }
  0xe5   :  { %560 = vmatprep.mubr.msk.f32.mxu1 %vm41_vm0, %v123_v26 }
  0xe6   :  { %561 = vmatmul.mubr.msk.f32.vlgmr.msra.gmra.mrb[0].mxu1 %vm41_vm0, %v124_v27 }
  0xe7   :  { %623 = vmatpush3.bf16.msra.mxu1 %v620_v33 }
  0xe8   :  { %625 = vmatprep.subr.bf16.mxu1 %v624_v44 }
  0xeb   :  { %627 = vmatpush3.bf16.msra.mxu1 %v624_v44 }
 0x1b9   :  { %v562_v36 = vpop.f32.mrb[0].mxu1 }
 0x1ba   :  { %v207_v37 = vadd.f32 %v562_v36, %v128_v35  ;;  %v201_v38 = vpop.f32.mrb[1].mxu1 }
 0x1bb   :  { %v202_v39 = vadd.f32 %v201_v38, %v128_v35 }
 0x1bc   :  { %v211_v41 = vmax.f32 %v207_v37, 0.0 }
 0x1bd   :  { %v210_v40 = vmax.f32 %v202_v39, 0.0 }
 0x1bf   :  { %571 = vmatprep.mubr.msk.f32.mxu0 %vm41_vm0, %v210_v40 }
 0x1c0   :  { %572 = vmatmul.mubr.msk.f32.vlgmr.msra.gmra.mrb[2].mxu0 %vm41_vm0, %v211_v41 }
 0x1c1   :  { %631 = vmatpush3.bf16.msra.mxu0 %v620_v33 }
 0x1c2   :  { %633 = vmatprep.subr.bf16.mxu0 %v624_v44 }
 0x1c5   :  { %635 = vmatpush3.bf16.msra.mxu0 %v624_v44 }
 0x293   :  { %v573_v47 = vpop.f32.mrb[2].mxu0 }
 0x294   :  { %v292_v48 = vadd.f32 %v573_v47, %v213_v45  ;;  %v286_v49 = vpop.f32.mrb[3].mxu0 }
 0x295   :  { %v287_v50 = vadd.f32 %v286_v49, %v212_v46 }
 0x296   :  { %v377_v52 = vmul.f32 %v292_v48, %v292_v48 }
 0x297   :  { %v376_v51 = vmul.f32 %v287_v50, %v287_v50  ;;  %582 = vmatprep.mubr.msk.f32.mxu1 %vm41_vm0, %v287_v50 }
 0x298   :  { %583 = vmatmul.mubr.msk.f32.vlgmr.msra.gmra.mrb[2].mxu1 %vm41_vm0, %v292_v48 }
 0x299   :  { %593 = vmatprep.mubr.msk.f32.mxu0 %vm41_vm0, %v376_v51 }
 0x29a   :  { %594 = vmatmul.mubr.msk.f32.vlgmr.msra.gmra.mrb[4].mxu0 %vm41_vm0, %v377_v52 }
 0x36b   :  { %v584_v53 = vpop.f32.mrb[2].mxu1 }
 0x36c   :  { %v460_v54 = vmul.f32 %v584_v53, %v584_v53  ;;  %v367_v55 = vpop.f32.mrb[3].mxu1  ;;  %v464_v2 = vsub.f32 %v292_v48, %v584_v53 }
 0x36d   :  { %v459_v56 = vmul.f32 %v367_v55, %v367_v55  ;;  %v595_v57 = vpop.f32.mrb[4].mxu0  ;;  %v463_v4 = vsub.f32 %v287_v50, %v367_v55 }
 0x36e   :  { %v462_v58 = vsub.f32 %v595_v57, %v460_v54  ;;  %v450_v59 = vpop.f32.mrb[5].mxu0 }
 0x36f   :  { %v461_v60 = vsub.f32 %v450_v59, %v459_v56 }
 0x370   :  { %v466_v61 = vadd.f32 1e-06, %v462_v58 }
 0x371   :  { %v465_v62 = vadd.f32 1e-06, %v461_v60 }
 0x372   :  { %639 = vrsqrt.f32 %v466_v61 }
 0x373   :  { %641 = vrsqrt.f32 %v465_v62 }
 0x37c   :  { %v640_v3 = vpop.eup %639 }
 0x37d   :  { %v642_v5 = vpop.eup %641  ;;  %v470_v7 = vmul.f32 %v640_v3, %v464_v2 }
 0x37e   :  { %v469_v8 = vmul.f32 %v642_v5, %v463_v4 }
 0x37f   :  { %v476_v9 = vmul.f32 %v474_v1, %v470_v7 }
 0x380   :  { %v475_v10 = vmul.f32 %v474_v1, %v469_v8 }
 0x381   :  { %v482_v11 = vadd.f32 %v480_v6, %v476_v9 }
 0x382   :  { %v481_v12 = vadd.f32 %v480_v6, %v475_v10 }
 0x383   :  { %484 = vst.msk [vmem:[#allocation2 + $0x8] sm:$0xff] %vm41_vm0, %v482_v11 }
 0x384   :  { %483 = vst.msk [vmem:[#allocation2] sm:$0xff] %vm41_vm0, %v481_v12 }
 0x385   :  { %654 = shalt.err (!%p651_p4)
}
 0x386   :  { %s655_s6 = scalar_lea.hbm %s798_s4, 256 }
 0x387   :  { %p656_p5 = scmp.ne.s32.totalorder %s798_s4, %s655_s6  ;;  %p659_p6 = scmp.lt.u32.totalorder %s655_s6, %s798_s4 }
 0x389   :  { %p661_p7 = pnand %p659_p6, %p656_p5 }
 0x38b   :  { %664 = shalt.err (!%p661_p7)
}
 0x38c   :  { %s668_s11 = smov 128   ;;  %s669_s12 = smov 8  }
 0x38d   :  { %496 = dma.vmem_to_hbm [thread:$0]  %s491_s3, 256, %s798_s4, [#allocation3], %s668_s11, %s668_s11, %s669_s12  }
 0x38e   :  { %665 = dma.done.wait [#allocation3], 256  }
 0x38f   :  { %666 = vsyncadd [#allocation3], 4294967040 }
 0x390   :  { %500 = vsyncpa [#allocation3], 1 }

</bundles_post_ra>
